<compile_context>
chip_gen: v7x
topology: tpu7x:2x2x1
jax: 0.10.0
libtpu: 0.0.40
codegen_flags: <defaults>
</compile_context>

<pallas_src>
import functools

import jax
import jax.numpy as jnp
from jax.experimental import pallas as pl
from jax.experimental.pallas import tpu as pltpu

_MIB = 1024 * 1024


# ----------------------------------------------------------------------------
# Kernels
# ----------------------------------------------------------------------------
def _encoder_kernel(x_ref,
                    w1_ref, s1_ref, t1_ref,
                    w2_ref, s2_ref, t2_ref,
                    w3_ref, s3_ref, t3_ref,
                    w4_ref, s4_ref, t4_ref,
                    g_ref, *, n_points, masked):
    # One (batch, point-tile) step, channels-major.  x block: (1, Cin, nt);
    # weights (Cout, Cin) bf16; BN scale/shift (Cout, 1) f32 on the f32 acc.
    h = x_ref[0].astype(jnp.bfloat16)                                   # (Cin, nt)

    def layer(h, w_ref, s_ref, t_ref, to_bf16):
        a = jnp.dot(w_ref[...], h, preferred_element_type=jnp.float32)  # (Cout, nt)
        a = jnp.maximum(a * s_ref[...] + t_ref[...], 0.0)
        return a.astype(jnp.bfloat16) if to_bf16 else a

    h = layer(h, w1_ref, s1_ref, t1_ref, True)
    h = layer(h, w2_ref, s2_ref, t2_ref, True)
    h = layer(h, w3_ref, s3_ref, t3_ref, True)
    h = layer(h, w4_ref, s4_ref, t4_ref, False)                         # (128, nt) f32

    if masked:  # last point tile may be padded: mask pad columns to -inf
        nt = h.shape[1]
        col = pl.program_id(1) * nt + jax.lax.broadcasted_iota(jnp.int32, h.shape, 1)
        h = jnp.where(col < n_points, h, -jnp.inf)

    g_ref[0, 0] = jnp.max(h, axis=1, keepdims=True)                     # (128, 1)


def _decoder_fc12_kernel(g_ref, w1_ref, s1_ref, t1_ref,
                         w2_ref, s2_ref, t2_ref, h2_ref, h1_ref):
    # fc1 (tiny) computed once at j == 0 into VMEM scratch; each grid step then
    # produces one ReLU'd fc2 column tile against the streamed w2 column tile.
    # Dropout is identity in eval mode.
    @pl.when(pl.program_id(0) == 0)
    def _():
        a = jnp.dot(g_ref[...].astype(jnp.bfloat16), w1_ref[...],
                    preferred_element_type=jnp.float32)
        h1_ref[...] = jnp.maximum(a * s1_ref[...] + t1_ref[...], 0.0).astype(jnp.bfloat16)

    a = jnp.dot(h1_ref[...], w2_ref[...], preferred_element_type=jnp.float32)
    h2_ref[...] = jnp.maximum(a * s2_ref[...] + t2_ref[...], 0.0).astype(jnp.bfloat16)


def _decoder_fc3_kernel(h2_ref, w3_ref, b3_ref, out_ref):
    # One column tile of fc3: (B, N) @ (N, tn) + bias, f32 accumulation/output.
    out_ref[...] = (jnp.dot(h2_ref[...], w3_ref[...],
                            preferred_element_type=jnp.float32) + b3_ref[...])


# ----------------------------------------------------------------------------
# Tile-size / VMEM-plan helpers (block shapes are multiples of 128 or the full
# extent, so the (8, 128) BlockSpec constraint is always satisfied).
# ----------------------------------------------------------------------------
def _point_tile_plan(n, cap=2048):
    """Point-tile size, number of tiles, and whether the last tile needs masking."""
    if n <= cap:
        return n, 1, False
    t = (cap // 128) * 128
    while t >= 128:
        if n % t == 0:
            return t, n // t, False
        t -= 128
    nt = (cap // 128) * 128
    return nt, pl.cdiv(n, nt), True


def _pick_col_tile(total, per_col_bytes, budget_bytes, cap):
    """Largest multiple-of-128 column tile dividing `total`, <= cap, whose
    double-buffered footprint fits the budget (falls back to 128 / full)."""
    if total % 128 != 0 or total <= 256:
        return total
    t = (min(cap, total) // 128) * 128
    while t > 128:
        if total % t == 0 and 2 * t * per_col_bytes <= budget_bytes:
            return t
        t -= 128
    return 128


def _vmem_limit(estimate_bytes):
    # >= 16 MiB (safe floor), <= 56 MiB (below v7x's 64 MiB physical VMEM).
    return int(max(16 * _MIB, min(int(estimate_bytes) + 4 * _MIB, 56 * _MIB)))


# ----------------------------------------------------------------------------
# Wrappers
# ----------------------------------------------------------------------------
def encode(x, enc_params):
    B, N, Cin = x.shape
    xt = jnp.transpose(x, (0, 2, 1))            # (B, Cin, N): points on lane axis
    nt, n_tiles, masked = _point_tile_plan(N)

    kernel = functools.partial(_encoder_kernel, n_points=N, masked=masked)

    args = [xt]
    in_specs = [pl.BlockSpec((1, Cin, nt), lambda b, k: (b, 0, k))]
    for w, s, t in enc_params:
        args += [w, s, t]
        in_specs += [pl.BlockSpec(w.shape, lambda b, k: (0, 0)),
                     pl.BlockSpec(s.shape, lambda b, k: (0, 0)),
                     pl.BlockSpec(t.shape, lambda b, k: (0, 0))]

    flops = 2 * B * N * sum(int(w.shape[0]) * int(w.shape[1]) for w, _, _ in enc_params)
    bytes_acc = int(B * N * Cin * 4
                    + sum(w.size * 2 + s.size * 4 + t.size * 4 for w, s, t in enc_params)
                    + B * n_tiles * 128 * 4)

    partial_max = pl.pallas_call(
        kernel,
        out_shape=jax.ShapeDtypeStruct((B, n_tiles, 128, 1), jnp.float32),
        grid=(B, n_tiles),
        in_specs=in_specs,
        out_specs=pl.BlockSpec((1, 1, 128, 1), lambda b, k: (b, k, 0, 0)),
        compiler_params=pltpu.CompilerParams(
            dimension_semantics=("parallel", "parallel"),
            vmem_limit_bytes=32 * _MIB),
        cost_estimate=pl.CostEstimate(flops=flops, transcendentals=0,
                                      bytes_accessed=bytes_acc),
    )(*args)
    # Tiny combine of per-tile maxima in XLA keeps both grid axes "parallel".
    return jnp.max(partial_max, axis=1)[..., 0]                     # (B, 128)


def decode(g, dec_params):
    B = g.shape[0]
    (w1, s1, t1), (w2, s2, t2), (w3, b3) = dec_params
    half, n_points = w2.shape
    out_cols = w3.shape[1]

    # ---- Stage 1: fc1 -> BN -> ReLU -> fc2 -> BN -> ReLU, streamed over w2
    # column tiles so the big weight is pipelined from HBM, never held whole.
    per_col2 = half * 2 + B * 2 + 8
    tn2 = _pick_col_tile(n_points, per_col2, 24 * _MIB, cap=2048)
    fixed2 = 2 * (w1.size * 2 + s1.size * 4 + t1.size * 4) + 2 * g.size * 4 + B * half * 2
    vmem2 = _vmem_limit(fixed2 + 2 * tn2 * per_col2)
    flops2 = 2 * B * (128 * half + half * n_points)
    bytes2 = int(g.size * 4 + w1.size * 2 + w2.size * 2
                 + (s1.size + t1.size + s2.size + t2.size) * 4 + B * n_points * 2)

    h2 = pl.pallas_call(
        _decoder_fc12_kernel,
        out_shape=jax.ShapeDtypeStruct((B, n_points), jnp.bfloat16),
        grid=(n_points // tn2,),
        in_specs=[pl.BlockSpec((B, 128), lambda j: (0, 0)),
                  pl.BlockSpec((128, half), lambda j: (0, 0)),
                  pl.BlockSpec((1, half), lambda j: (0, 0)),
                  pl.BlockSpec((1, half), lambda j: (0, 0)),
                  pl.BlockSpec((half, tn2), lambda j: (0, j)),
                  pl.BlockSpec((1, tn2), lambda j: (0, j)),
                  pl.BlockSpec((1, tn2), lambda j: (0, j))],
        out_specs=pl.BlockSpec((B, tn2), lambda j: (0, j)),
        scratch_shapes=[pltpu.VMEM((B, half), jnp.bfloat16)],
        compiler_params=pltpu.CompilerParams(
            dimension_semantics=("arbitrary",),
            vmem_limit_bytes=vmem2),
        cost_estimate=pl.CostEstimate(flops=flops2, transcendentals=0,
                                      bytes_accessed=bytes2),
    )(g, w1, s1, t1, w2, s2, t2)

    # ---- Stage 2: fc3 streamed over output-column tiles of w3 (HBM-bound).
    # Tile size and VMEM limit are derived from N so the plan fits v7x (64 MiB)
    # while still using large tiles (>=2048) on v5e/v6e.
    per_col3 = n_points * 2 + B * 4 + 4
    tn3 = _pick_col_tile(out_cols, per_col3, 36 * _MIB, cap=4096)
    vmem3 = _vmem_limit(2 * tn3 * per_col3 + 2 * B * n_points * 2)
    flops3 = 2 * B * n_points * out_cols
    bytes3 = int(B * n_points * 2 + w3.size * 2 + out_cols * 4 + B * out_cols * 4)

    out = pl.pallas_call(
        _decoder_fc3_kernel,
        out_shape=jax.ShapeDtypeStruct((B, out_cols), jnp.float32),
        grid=(out_cols // tn3,),
        in_specs=[pl.BlockSpec((B, n_points), lambda j: (0, 0)),
                  pl.BlockSpec((n_points, tn3), lambda j: (0, j)),
                  pl.BlockSpec((1, tn3), lambda j: (0, j))],
        out_specs=pl.BlockSpec((B, tn3), lambda j: (0, j)),
        compiler_params=pltpu.CompilerParams(
            dimension_semantics=("parallel",),
            vmem_limit_bytes=vmem3),
        cost_estimate=pl.CostEstimate(flops=flops3, transcendentals=0,
                                      bytes_accessed=bytes3),
    )(h2, w3, b3)
    return out


def pointnet_ae_forward(x, params):
    """x: (B, n_points, in_dim) -> (reconstructed (B, N, in_dim), global_feature (B, 128))."""
    enc_params, dec_params = params
    B, N, Cin = x.shape
    global_feature = encode(x, enc_params)               # (B, 128)
    flat = decode(global_feature, dec_params)            # (B, 3*N)
    # Matches the PyTorch module exactly: fc3 output reshaped point-major to
    # (B, n_points, in_dim); only consistent when in_dim == 3 (as in the spec).
    reconstructed = flat.reshape(B, N, Cin)
    return reconstructed, global_feature


# ----------------------------------------------------------------------------
# Deterministic parameter construction.  Eval-mode BatchNorm is expressed as
# (scale, shift); the scale stays f32 and is applied in the kernel epilogue
# (not folded into the bf16 weights).
# ----------------------------------------------------------------------------
def init_params(key, in_dim, n_points):
    eps = 1e-5
    half = n_points // 2
    conv_dims = [(in_dim, 64), (64, 64), (64, 64), (64, 128)]
    fc_dims = [(128, half), (half, n_points), (n_points, n_points * 3)]

    keys = iter(jax.random.split(key, 64))

    def dense(cin, cout):
        w = jax.random.normal(next(keys), (cin, cout), jnp.float32) / jnp.sqrt(float(cin))
        b = 0.01 * jax.random.normal(next(keys), (cout,), jnp.float32)
        return w, b

    def bn_stats(c):
        gamma = 1.0 + 0.1 * jax.random.normal(next(keys), (c,), jnp.float32)
        beta = 0.1 * jax.random.normal(next(keys), (c,), jnp.float32)
        mean = 0.1 * jax.random.normal(next(keys), (c,), jnp.float32)
        var = 1.0 + 0.1 * jnp.abs(jax.random.normal(next(keys), (c,), jnp.float32))
        return gamma, beta, mean, var

    def bn_affine(b, gamma, beta, mean, var):
        scale = gamma / jnp.sqrt(var + eps)
        shift = scale * (b - mean) + beta
        return scale, shift

    enc = []
    for cin, cout in conv_dims:
        w, b = dense(cin, cout)
        scale, shift = bn_affine(b, *bn_stats(cout))
        # channels-major: (Cout, Cin) bf16 weight; (Cout, 1) f32 scale/shift.
        enc.append((jnp.transpose(w).astype(jnp.bfloat16),
                    scale[:, None], shift[:, None]))

    dec = []
    for i, (cin, cout) in enumerate(fc_dims):
        w, b = dense(cin, cout)
        if i < 2:
            scale, shift = bn_affine(b, *bn_stats(cout))
            dec.append((w.astype(jnp.bfloat16), scale[None, :], shift[None, :]))
        else:
            dec.append((w.astype(jnp.bfloat16), b[None, :]))
    return enc, dec


# ----------------------------------------------------------------------------
# Pure-JAX f32 reference for a correctness sanity check.
# ----------------------------------------------------------------------------
def reference_forward(x, params):
    enc, dec = params
    B, N, Cin = x.shape
    h = x
    for w, s, t in enc:  # w: (Cout, Cin) bf16, s/t: (Cout, 1) f32
        h = jnp.maximum(
            jnp.einsum('bnc,oc->bno', h, w.astype(jnp.float32), precision='highest')
            * s[:, 0] + t[:, 0], 0.0)
    g = jnp.max(h, axis=1)
    (w1, s1, t1), (w2, s2, t2), (w3, b3) = dec
    d = jnp.maximum(jnp.dot(g, w1.astype(jnp.float32), precision='highest') * s1 + t1, 0.0)
    d = jnp.maximum(jnp.dot(d, w2.astype(jnp.float32), precision='highest') * s2 + t2, 0.0)
    flat = jnp.dot(d, w3.astype(jnp.float32), precision='highest') + b3
    return flat.reshape(B, N, Cin), g


if __name__ == "__main__":
    B, N_POINTS, IN_DIM = 2, 16, 3            # small shapes consistent with the module

    root = jax.random.PRNGKey(0)
    k_params, k_x = jax.random.split(root)
    params = init_params(k_params, IN_DIM, N_POINTS)
    x = jax.random.normal(k_x, (B, N_POINTS, IN_DIM), jnp.float32)

    recon, gfeat = pointnet_ae_forward(x, params)
    jax.block_until_ready((recon, gfeat))

    recon_ref, gfeat_ref = reference_forward(x, params)
    assert recon.shape == (B, N_POINTS, IN_DIM)
    assert gfeat.shape == (B, 128)
    # Kernels use bf16 weights/activations with f32 accumulation; reference is f32.
    assert jnp.allclose(gfeat, gfeat_ref, rtol=5e-2, atol=5e-2), \
        float(jnp.max(jnp.abs(gfeat - gfeat_ref)))
    assert jnp.allclose(recon, recon_ref, rtol=5e-2, atol=5e-2), \
        float(jnp.max(jnp.abs(recon - recon_ref)))

    print("KERNEL_OK")
</pallas_src>

<mosaic_0001>
module attributes {stable_mosaic.version = 11 : i64} {
  func.func @_encoder_kernel(%arg0: i32, %arg1: i32, %arg2: memref<1x3x16xf32, #tpu.memory_space<vmem>>, %arg3: memref<64x3xbf16, #tpu.memory_space<vmem>>, %arg4: memref<64x1xf32, #tpu.memory_space<vmem>>, %arg5: memref<64x1xf32, #tpu.memory_space<vmem>>, %arg6: memref<64x64xbf16, #tpu.memory_space<vmem>>, %arg7: memref<64x1xf32, #tpu.memory_space<vmem>>, %arg8: memref<64x1xf32, #tpu.memory_space<vmem>>, %arg9: memref<64x64xbf16, #tpu.memory_space<vmem>>, %arg10: memref<64x1xf32, #tpu.memory_space<vmem>>, %arg11: memref<64x1xf32, #tpu.memory_space<vmem>>, %arg12: memref<128x64xbf16, #tpu.memory_space<vmem>>, %arg13: memref<128x1xf32, #tpu.memory_space<vmem>>, %arg14: memref<128x1xf32, #tpu.memory_space<vmem>>, %arg15: memref<1x1x128x1xf32, #tpu.memory_space<vmem>>) attributes {dimension_semantics = [#tpu.dimension_semantics<parallel>, #tpu.dimension_semantics<parallel>], iteration_bounds = array<i64: 2, 1>, scalar_prefetch = 0 : i64, scratch_operands = 0 : i64, tpu.core_type = #tpu.core_type<tc>, window_params = [{transform_indices = @transform_0, window_bounds = array<i64: 1, 3, 16>}, {pipeline_mode = #tpu.pipeline_mode<synchronous>, transform_indices = @transform_1, window_bounds = array<i64: 64, 3>}, {pipeline_mode = #tpu.pipeline_mode<synchronous>, transform_indices = @transform_2, window_bounds = array<i64: 64, 1>}, {pipeline_mode = #tpu.pipeline_mode<synchronous>, transform_indices = @transform_3, window_bounds = array<i64: 64, 1>}, {pipeline_mode = #tpu.pipeline_mode<synchronous>, transform_indices = @transform_4, window_bounds = array<i64: 64, 64>}, {pipeline_mode = #tpu.pipeline_mode<synchronous>, transform_indices = @transform_5, window_bounds = array<i64: 64, 1>}, {pipeline_mode = #tpu.pipeline_mode<synchronous>, transform_indices = @transform_6, window_bounds = array<i64: 64, 1>}, {pipeline_mode = #tpu.pipeline_mode<synchronous>, transform_indices = @transform_7, window_bounds = array<i64: 64, 64>}, {pipeline_mode = #tpu.pipeline_mode<synchronous>, transform_indices = @transform_8, window_bounds = array<i64: 64, 1>}, {pipeline_mode = #tpu.pipeline_mode<synchronous>, transform_indices = @transform_9, window_bounds = array<i64: 64, 1>}, {pipeline_mode = #tpu.pipeline_mode<synchronous>, transform_indices = @transform_10, window_bounds = array<i64: 128, 64>}, {pipeline_mode = #tpu.pipeline_mode<synchronous>, transform_indices = @transform_11, window_bounds = array<i64: 128, 1>}, {pipeline_mode = #tpu.pipeline_mode<synchronous>, transform_indices = @transform_12, window_bounds = array<i64: 128, 1>}, {transform_indices = @transform_13, window_bounds = array<i64: 1, 1, 128, 1>}]} {
    %c0 = arith.constant 0 : index
    %c0_0 = arith.constant 0 : index
    %c0_1 = arith.constant 0 : index
    %0 = vector.load %arg2[%c0, %c0_0, %c0_1] : memref<1x3x16xf32, #tpu.memory_space<vmem>>, vector<1x3x16xf32>
    %1 = vector.shape_cast %0 : vector<1x3x16xf32> to vector<3x16xf32>
    %2 = arith.truncf %1 : vector<3x16xf32> to vector<3x16xbf16>
    %c0_2 = arith.constant 0 : index
    %c0_3 = arith.constant 0 : index
    %3 = vector.load %arg3[%c0_2, %c0_3] : memref<64x3xbf16, #tpu.memory_space<vmem>>, vector<64x3xbf16>
    %cst = arith.constant dense<0.000000e+00> : vector<64x16xf32>
    %4 = tpu.matmul %3, %2, %cst {dimension_numbers = #tpu.dot_dimension_numbers<[1], [0], [0], [1], [0, 0, 1, 1], [], []>} : vector<64x3xbf16>, vector<3x16xbf16>, vector<64x16xf32> -> vector<64x16xf32>
    %c0_4 = arith.constant 0 : index
    %c0_5 = arith.constant 0 : index
    %5 = vector.load %arg4[%c0_4, %c0_5] : memref<64x1xf32, #tpu.memory_space<vmem>>, vector<64x1xf32>
    %6 = vector.broadcast %5 : vector<64x1xf32> to vector<64x16xf32>
    %7 = arith.mulf %4, %6 : vector<64x16xf32>
    %c0_6 = arith.constant 0 : index
    %c0_7 = arith.constant 0 : index
    %8 = vector.load %arg5[%c0_6, %c0_7] : memref<64x1xf32, #tpu.memory_space<vmem>>, vector<64x1xf32>
    %9 = vector.broadcast %8 : vector<64x1xf32> to vector<64x16xf32>
    %10 = arith.addf %7, %9 : vector<64x16xf32>
    %cst_8 = arith.constant 0.000000e+00 : f32
    %11 = vector.broadcast %cst_8 : f32 to vector<64x16xf32>
    %12 = arith.maximumf %10, %11 : vector<64x16xf32>
    %13 = arith.truncf %12 : vector<64x16xf32> to vector<64x16xbf16>
    %c0_9 = arith.constant 0 : index
    %c0_10 = arith.constant 0 : index
    %14 = vector.load %arg6[%c0_9, %c0_10] : memref<64x64xbf16, #tpu.memory_space<vmem>>, vector<64x64xbf16>
    %cst_11 = arith.constant dense<0.000000e+00> : vector<64x16xf32>
    %15 = tpu.matmul %14, %13, %cst_11 {dimension_numbers = #tpu.dot_dimension_numbers<[1], [0], [0], [1], [0, 0, 1, 1], [], []>} : vector<64x64xbf16>, vector<64x16xbf16>, vector<64x16xf32> -> vector<64x16xf32>
    %c0_12 = arith.constant 0 : index
    %c0_13 = arith.constant 0 : index
    %16 = vector.load %arg7[%c0_12, %c0_13] : memref<64x1xf32, #tpu.memory_space<vmem>>, vector<64x1xf32>
    %17 = vector.broadcast %16 : vector<64x1xf32> to vector<64x16xf32>
    %18 = arith.mulf %15, %17 : vector<64x16xf32>
    %c0_14 = arith.constant 0 : index
    %c0_15 = arith.constant 0 : index
    %19 = vector.load %arg8[%c0_14, %c0_15] : memref<64x1xf32, #tpu.memory_space<vmem>>, vector<64x1xf32>
    %20 = vector.broadcast %19 : vector<64x1xf32> to vector<64x16xf32>
    %21 = arith.addf %18, %20 : vector<64x16xf32>
    %cst_16 = arith.constant 0.000000e+00 : f32
    %22 = vector.broadcast %cst_16 : f32 to vector<64x16xf32>
    %23 = arith.maximumf %21, %22 : vector<64x16xf32>
    %24 = arith.truncf %23 : vector<64x16xf32> to vector<64x16xbf16>
    %c0_17 = arith.constant 0 : index
    %c0_18 = arith.constant 0 : index
    %25 = vector.load %arg9[%c0_17, %c0_18] : memref<64x64xbf16, #tpu.memory_space<vmem>>, vector<64x64xbf16>
    %cst_19 = arith.constant dense<0.000000e+00> : vector<64x16xf32>
    %26 = tpu.matmul %25, %24, %cst_19 {dimension_numbers = #tpu.dot_dimension_numbers<[1], [0], [0], [1], [0, 0, 1, 1], [], []>} : vector<64x64xbf16>, vector<64x16xbf16>, vector<64x16xf32> -> vector<64x16xf32>
    %c0_20 = arith.constant 0 : index
    %c0_21 = arith.constant 0 : index
    %27 = vector.load %arg10[%c0_20, %c0_21] : memref<64x1xf32, #tpu.memory_space<vmem>>, vector<64x1xf32>
    %28 = vector.broadcast %27 : vector<64x1xf32> to vector<64x16xf32>
    %29 = arith.mulf %26, %28 : vector<64x16xf32>
    %c0_22 = arith.constant 0 : index
    %c0_23 = arith.constant 0 : index
    %30 = vector.load %arg11[%c0_22, %c0_23] : memref<64x1xf32, #tpu.memory_space<vmem>>, vector<64x1xf32>
    %31 = vector.broadcast %30 : vector<64x1xf32> to vector<64x16xf32>
    %32 = arith.addf %29, %31 : vector<64x16xf32>
    %cst_24 = arith.constant 0.000000e+00 : f32
    %33 = vector.broadcast %cst_24 : f32 to vector<64x16xf32>
    %34 = arith.maximumf %32, %33 : vector<64x16xf32>
    %35 = arith.truncf %34 : vector<64x16xf32> to vector<64x16xbf16>
    %c0_25 = arith.constant 0 : index
    %c0_26 = arith.constant 0 : index
    %36 = vector.load %arg12[%c0_25, %c0_26] : memref<128x64xbf16, #tpu.memory_space<vmem>>, vector<128x64xbf16>
    %cst_27 = arith.constant dense<0.000000e+00> : vector<128x16xf32>
    %37 = tpu.matmul %36, %35, %cst_27 {dimension_numbers = #tpu.dot_dimension_numbers<[1], [0], [0], [1], [0, 0, 1, 1], [], []>} : vector<128x64xbf16>, vector<64x16xbf16>, vector<128x16xf32> -> vector<128x16xf32>
    %c0_28 = arith.constant 0 : index
    %c0_29 = arith.constant 0 : index
    %38 = vector.load %arg13[%c0_28, %c0_29] : memref<128x1xf32, #tpu.memory_space<vmem>>, vector<128x1xf32>
    %39 = vector.broadcast %38 : vector<128x1xf32> to vector<128x16xf32>
    %40 = arith.mulf %37, %39 : vector<128x16xf32>
    %c0_30 = arith.constant 0 : index
    %c0_31 = arith.constant 0 : index
    %41 = vector.load %arg14[%c0_30, %c0_31] : memref<128x1xf32, #tpu.memory_space<vmem>>, vector<128x1xf32>
    %42 = vector.broadcast %41 : vector<128x1xf32> to vector<128x16xf32>
    %43 = arith.addf %40, %42 : vector<128x16xf32>
    %cst_32 = arith.constant 0.000000e+00 : f32
    %44 = vector.broadcast %cst_32 : f32 to vector<128x16xf32>
    %45 = arith.maximumf %43, %44 : vector<128x16xf32>
    %cst_33 = arith.constant dense<0xFF800000> : vector<128xf32>
    %46 = vector.multi_reduction <maximumf>, %45, %cst_33 [1] : vector<128x16xf32> to vector<128xf32>
    %47 = vector.shape_cast %46 : vector<128xf32> to vector<128x1xf32>
    %c0_34 = arith.constant 0 : index
    %c0_35 = arith.constant 0 : index
    %c0_36 = arith.constant 0 : index
    %c0_37 = arith.constant 0 : index
    %48 = vector.load %arg15[%c0_34, %c0_35, %c0_36, %c0_37] : memref<1x1x128x1xf32, #tpu.memory_space<vmem>>, vector<1x1x128x1xf32>
    %49 = vector.shape_cast %48 : vector<1x1x128x1xf32> to vector<128x1xf32>
    %50 = vector.shape_cast %47 : vector<128x1xf32> to vector<1x1x128x1xf32>
    tpu.vector_store %arg15[%c0_34, %c0_35, %c0_36, %c0_37], %50 {strides = array<i32>} : memref<1x1x128x1xf32, #tpu.memory_space<vmem>>, vector<1x1x128x1xf32>,
    return
  }
  func.func @transform_0(%arg0: i32, %arg1: i32) -> (i32, i32, i32) {
    %c0_i32 = arith.constant 0 : i32
    %c0_i32_0 = arith.constant 0 : i32
    return %arg0, %c0_i32, %arg1 : i32, i32, i32
  }
  func.func @transform_1(%arg0: i32, %arg1: i32) -> (i32, i32) {
    %c0_i32 = arith.constant 0 : i32
    %c0_i32_0 = arith.constant 0 : i32
    %c0_i32_1 = arith.constant 0 : i32
    return %c0_i32, %c0_i32_0 : i32, i32
  }
  func.func @transform_2(%arg0: i32, %arg1: i32) -> (i32, i32) {
    %c0_i32 = arith.constant 0 : i32
    %c0_i32_0 = arith.constant 0 : i32
    %c0_i32_1 = arith.constant 0 : i32
    return %c0_i32, %c0_i32_0 : i32, i32
  }
  func.func @transform_3(%arg0: i32, %arg1: i32) -> (i32, i32) {
    %c0_i32 = arith.constant 0 : i32
    %c0_i32_0 = arith.constant 0 : i32
    %c0_i32_1 = arith.constant 0 : i32
    return %c0_i32, %c0_i32_0 : i32, i32
  }
  func.func @transform_4(%arg0: i32, %arg1: i32) -> (i32, i32) {
    %c0_i32 = arith.constant 0 : i32
    %c0_i32_0 = arith.constant 0 : i32
    %c0_i32_1 = arith.constant 0 : i32
    return %c0_i32, %c0_i32_0 : i32, i32
  }
  func.func @transform_5(%arg0: i32, %arg1: i32) -> (i32, i32) {
    %c0_i32 = arith.constant 0 : i32
    %c0_i32_0 = arith.constant 0 : i32
    %c0_i32_1 = arith.constant 0 : i32
    return %c0_i32, %c0_i32_0 : i32, i32
  }
  func.func @transform_6(%arg0: i32, %arg1: i32) -> (i32, i32) {
    %c0_i32 = arith.constant 0 : i32
    %c0_i32_0 = arith.constant 0 : i32
    %c0_i32_1 = arith.constant 0 : i32
    return %c0_i32, %c0_i32_0 : i32, i32
  }
  func.func @transform_7(%arg0: i32, %arg1: i32) -> (i32, i32) {
    %c0_i32 = arith.constant 0 : i32
    %c0_i32_0 = arith.constant 0 : i32
    %c0_i32_1 = arith.constant 0 : i32
    return %c0_i32, %c0_i32_0 : i32, i32
  }
  func.func @transform_8(%arg0: i32, %arg1: i32) -> (i32, i32) {
    %c0_i32 = arith.constant 0 : i32
    %c0_i32_0 = arith.constant 0 : i32
    %c0_i32_1 = arith.constant 0 : i32
    return %c0_i32, %c0_i32_0 : i32, i32
  }
  func.func @transform_9(%arg0: i32, %arg1: i32) -> (i32, i32) {
    %c0_i32 = arith.constant 0 : i32
    %c0_i32_0 = arith.constant 0 : i32
    %c0_i32_1 = arith.constant 0 : i32
    return %c0_i32, %c0_i32_0 : i32, i32
  }
  func.func @transform_10(%arg0: i32, %arg1: i32) -> (i32, i32) {
    %c0_i32 = arith.constant 0 : i32
    %c0_i32_0 = arith.constant 0 : i32
    %c0_i32_1 = arith.constant 0 : i32
    return %c0_i32, %c0_i32_0 : i32, i32
  }
  func.func @transform_11(%arg0: i32, %arg1: i32) -> (i32, i32) {
    %c0_i32 = arith.constant 0 : i32
    %c0_i32_0 = arith.constant 0 : i32
    %c0_i32_1 = arith.constant 0 : i32
    return %c0_i32, %c0_i32_0 : i32, i32
  }
  func.func @transform_12(%arg0: i32, %arg1: i32) -> (i32, i32) {
    %c0_i32 = arith.constant 0 : i32
    %c0_i32_0 = arith.constant 0 : i32
    %c0_i32_1 = arith.constant 0 : i32
    return %c0_i32, %c0_i32_0 : i32, i32
  }
  func.func @transform_13(%arg0: i32, %arg1: i32) -> (i32, i32, i32, i32) {
    %c0_i32 = arith.constant 0 : i32
    %c0_i32_0 = arith.constant 0 : i32
    %c0_i32_1 = arith.constant 0 : i32
    return %arg0, %arg1, %c0_i32, %c0_i32_0 : i32, i32, i32, i32
  }
}

</mosaic_0001>

<bundles_post_ra>
// kernel: tpu_custom_call.1
= control target key start
LH: loop header
LB: loop body
LE: loop exit
PB: predicated region body
PF: predicated region fallthrough
CT: control target
= control target key end

     0   :  { %s2033_s25 = smov 0   ;;  %s2035_s26 = smov 0   ;;  %s2461_s0 = inlined_call_operand.vmem [shape: f32[2,3,16], index: 0, kind: input, shape index: {}]   ;;  %s2462_s1 = inlined_call_operand.vmem [shape: bf16[64,3], index: 1, kind: input, shape index: {}]   ;;  %s2463_s2 = inlined_call_operand.vmem [shape: f32[64,1], index: 2, kind: input, shape index: {}]   ;;  %s2464_s3 = inlined_call_operand.vmem [shape: f32[64,1], index: 3, kind: input, shape index: {}]   ;;  %s2465_s4 = inlined_call_operand.vmem [shape: bf16[64,64], index: 4, kind: input, shape index: {}]   ;;  %s2466_s5 = inlined_call_operand.vmem [shape: f32[64,1], index: 5, kind: input, shape index: {}]   ;;  %s2467_s6 = inlined_call_operand.vmem [shape: f32[64,1], index: 6, kind: input, shape index: {}]   ;;  %s2468_s7 = inlined_call_operand.vmem [shape: bf16[64,64], index: 7, kind: input, shape index: {}]   ;;  %s2469_s8 = inlined_call_operand.vmem [shape: f32[64,1], index: 8, kind: input, shape index: {}]   ;;  %s2470_s9 = inlined_call_operand.vmem [shape: f32[64,1], index: 9, kind: input, shape index: {}]   ;;  %s2471_s10 = inlined_call_operand.vmem [shape: bf16[128,64], index: 10, kind: input, shape index: {}]   ;;  %s2472_s11 = inlined_call_operand.vmem [shape: f32[128,1], index: 11, kind: input, shape index: {}]   ;;  %s2473_s12 = inlined_call_operand.vmem [shape: f32[128,1], index: 12, kind: input, shape index: {}]   ;;  %s2474_s13 = inlined_call_operand.vmem [shape: f32[2,1,128,1], index: 13, kind: output, shape index: {}]  }
   0x1   :  { %s2037_s27 = smov 0  }
   0x2 LB: > { %s35_s28 = sadd.s32 1, %s1955_s26  ;;  %p1743_p0 = scmp.ge.s32.totalorder %s1959_s27, 1  ;;  %s1959_s27 = sphi %s2037_s27, %s23_s27   ;;  %s1955_s26 = sphi %s2035_s26, %s2476_s26   ;;  %s1951_s25 = sphi %s2033_s25, %s2475_s25  }
   0x3   : > { %p37_p1 = scmp.ge.s32.totalorder %s35_s28, 2  ;;  %p405_p2 = scmp.lt.s32.totalorder %s1959_s27, 3 }
   0x5   : > { %s2478_s28 = smov (%p37_p1, %s35_s28), 0  ;;  %p406_p3 = pnand %p1743_p0, %p405_p2 }
   0x6   : > { %v643_v0 = vld [vmem:[%s2464_s3] sm:$0xff] (!%p406_p3)  ;;  %p455_p4 = scmp.lt.s32.totalorder (!%p406_p3), %s1951_s25, 1  ;;  %vm515_vm0 = vcmask (!%p406_p3), 1040384   ;;  %v1961_v2 = vmov (!%p406_p3), 0   ;;  %v644_v3 = vld [vmem:[%s2464_s3 + $0x8] sm:$0xff] (!%p406_p3)  ;;  %vm516_vm1 = vcmask (!%p406_p3), 1041408  }
   0x7   : > { %409 = sbr.rel (%p406_p3) target bundleno = 1137 (0x471), region = 72  ;;  %v587_v1 = vld [vmem:[%s2463_s2] sm:$0xff] (!%p406_p3)  ;;  %1916 = vset.pattern.permute.xlu1 (!%p406_p3), %v1961_v2  ;;  %1915 = vset.pattern.permute.xlu0 (!%p406_p3), %v1961_v2  ;;  %v588_v4 = vld [vmem:[%s2463_s2 + $0x8] sm:$0xff] (!%p406_p3)  ;;  %v1962_v5 = vmov (!%p406_p3), 65535   ;;  %vm502_vm2 = vcmask (!%p406_p3), 23552   ;;  %v590_v8 = vld [vmem:[%s2463_s2 + $0x18] sm:$0xff] (!%p406_p3) }
   0x8   : > { %653 = vperm.xlu1 (!%p406_p3), %1916, %v643_v0   ;;  %597 = vperm.xlu0 (!%p406_p3), %1915, %v587_v1   ;;  %v517_v6 = vsel (!%p406_p3), %vm515_vm0, 4294967295, %v1962_v5  ;;  %v1917_v7 = vld [vmem:[%s2462_s1] sm:$0xff] (!%p406_p3)   ;;  %v589_v11 = vld [vmem:[%s2463_s2 + $0x10] sm:$0xff] (!%p406_p3)  ;;  %v646_v14 = vld [vmem:[%s2464_s3 + $0x18] sm:$0xff] (!%p406_p3)  ;;  %vm739_vm3 = vcmask (!%p406_p3), 523264   ;;  %vm1587_vm4 = vcmask (!%p406_p3), 130048  }
   0x9   : > { %v518_v9 = vsel (!%p406_p3), %vm516_vm1, %v517_v6, 0  ;;  %1825 = vmatprep.mubr.msk.bf16.mxu0 (!%p406_p3), %vm502_vm2, %v1917_v7  ;;  %v645_v15 = vld [vmem:[%s2464_s3 + $0x10] sm:$0xff] (!%p406_p3)  ;;  %v1918_v16 = vld [vmem:[%s2462_s1 + $0x8] sm:$0xff] (!%p406_p3)   ;;  %v591_v19 = vld [vmem:[%s2463_s2 + $0x20] sm:$0xff] (!%p406_p3)  ;;  %vm1636_vm5 = vcmask (!%p406_p3), 7168  }
   0xa   : > { %v1919_v17 = vld [vmem:[%s2462_s1 + $0x10] sm:$0xff] (!%p406_p3)   ;;  %v592_v18 = vld [vmem:[%s2463_s2 + $0x28] sm:$0xff] (!%p406_p3)  ;;  %v647_v21 = vld [vmem:[%s2464_s3 + $0x20] sm:$0xff] (!%p406_p3) }
   0xb   : > { %v648_v20 = vld [vmem:[%s2464_s3 + $0x28] sm:$0xff] (!%p406_p3)  ;;  %v1920_v22 = vld [vmem:[%s2462_s1 + $0x18] sm:$0xff] (!%p406_p3)   ;;  %v593_v24 = vld [vmem:[%s2463_s2 + $0x30] sm:$0xff] (!%p406_p3) }
   0xc   : > { %658 = vperm.xlu1 (!%p406_p3), %1916, %v644_v3   ;;  %602 = vperm.xlu0 (!%p406_p3), %1915, %v588_v4   ;;  %v594_v23 = vld [vmem:[%s2463_s2 + $0x38] sm:$0xff] (!%p406_p3)  ;;  %v649_v26 = vld [vmem:[%s2464_s3 + $0x30] sm:$0xff] (!%p406_p3)  ;;  %v818_v27 = vld [vmem:[%s2466_s5 + $0x8] sm:$0xff] (!%p406_p3) }
   0xd   : > { %v650_v25 = vld [vmem:[%s2464_s3 + $0x38] sm:$0xff] (!%p406_p3)  ;;  %v817_v28 = vld [vmem:[%s2466_s5] sm:$0xff] (!%p406_p3)  ;;  %v874_v29 = vld [vmem:[%s2467_s6 + $0x8] sm:$0xff] (!%p406_p3) }
   0xe   : > { %s2480_s25 = smov (!%p455_p4, %s1951_s25), 1  ;;  %v873_v30 = vld [vmem:[%s2467_s6] sm:$0xff]  ;;  %v820_v31 = vld [vmem:[%s2466_s5 + $0x18] sm:$0xff]  ;;  %v819_v32 = vld [vmem:[%s2466_s5 + $0x10] sm:$0xff] }
   0xf   : > { %s1744_s22 = sshll.u32 %s2480_s25, 2  ;;  %v876_v33 = vld [vmem:[%s2467_s6 + $0x18] sm:$0xff]  ;;  %v875_v34 = vld [vmem:[%s2467_s6 + $0x10] sm:$0xff]  ;;  %v822_v35 = vld [vmem:[%s2466_s5 + $0x28] sm:$0xff]  ;;  %s1789_s21 = sshll.u32 %s2480_s25, 7 }
  0x10   : > { %s461_s14 = scalar_lea.vmem %s2461_s0, %s1744_s22  ;;  %612 = vperm.xlu1 %1916, %v590_v8   ;;  %607 = vperm.xlu0 %1915, %v589_v11   ;;  %v821_v36 = vld [vmem:[%s2466_s5 + $0x20] sm:$0xff]  ;;  %v878_v37 = vld [vmem:[%s2467_s6 + $0x28] sm:$0xff]  ;;  %v824_v39 = vld [vmem:[%s2466_s5 + $0x38] sm:$0xff]  ;;  %s2418_s24 = scalar_lea.vmem %s2474_s13, %s1789_s21 }
  0x11   : > { %v472_v10 = vld [vmem:[%s461_s14] sm:$0x7]  ;;  %v823_v40 = vld [vmem:[%s2466_s5 + $0x30] sm:$0xff]  ;;  %v880_v41 = vld [vmem:[%s2467_s6 + $0x38] sm:$0xff] }
  0x12   : > { %v473_v12 = vpack.c.bf16 %v472_v10, %v472_v10  ;;  %v877_v38 = vld [vmem:[%s2467_s6 + $0x20] sm:$0xff]  ;;  %v879_v42 = vld [vmem:[%s2467_s6 + $0x30] sm:$0xff]  ;;  %v1047_v43 = vld [vmem:[%s2469_s8 + $0x8] sm:$0xff] }
  0x13   : > { %v1046_v44 = vld [vmem:[%s2469_s8] sm:$0xff]  ;;  %v1103_v45 = vld [vmem:[%s2470_s9 + $0x8] sm:$0xff]  ;;  %v1049_v47 = vld [vmem:[%s2469_s8 + $0x18] sm:$0xff] }
  0x14   : > { %v520_v13 = vand.u32 %v518_v9, %v473_v12  ;;  %668 = vperm.xlu1 %1916, %v646_v14   ;;  %663 = vperm.xlu0 %1915, %v645_v15   ;;  %v1102_v46 = vld [vmem:[%s2470_s9] sm:$0xff]  ;;  %v1048_v48 = vld [vmem:[%s2469_s8 + $0x10] sm:$0xff]  ;;  %v1105_v49 = vld [vmem:[%s2470_s9 + $0x18] sm:$0xff] }
  0x15   : > { %v1104_v50 = vld [vmem:[%s2470_s9 + $0x10] sm:$0xff]  ;;  %v1051_v51 = vld [vmem:[%s2469_s8 + $0x28] sm:$0xff]  ;;  %v1050_v52 = vld [vmem:[%s2469_s8 + $0x20] sm:$0xff] }
  0x16   : > { %1823 = vmatprep.subr.bf16.mxu0 %v520_v13  ;;  %v1107_v53 = vld [vmem:[%s2470_s9 + $0x28] sm:$0xff]  ;;  %v1106_v54 = vld [vmem:[%s2470_s9 + $0x20] sm:$0xff]  ;;  %v1053_v55 = vld [vmem:[%s2469_s8 + $0x38] sm:$0xff] }
  0x17   : > { %1824 = vmatpush3.bf16.msra.mxu0 %v520_v13  ;;  %v1052_v56 = vld [vmem:[%s2469_s8 + $0x30] sm:$0xff]  ;;  %v1109_v57 = vld [vmem:[%s2470_s9 + $0x38] sm:$0xff]  ;;  %v1348_v59 = vld [vmem:[%s2472_s11 + $0x8] sm:$0xff] }
  0x18   : > { %622 = vperm.xlu1 %1916, %v592_v18   ;;  %617 = vperm.xlu0 %1915, %v591_v19   ;;  %v1108_v58 = vld [vmem:[%s2470_s9 + $0x30] sm:$0xff]  ;;  %v1347_v60 = vld [vmem:[%s2472_s11] sm:$0xff]  ;;  %v1350_v61 = vld [vmem:[%s2472_s11 + $0x18] sm:$0xff] }
  0x19   : > { %v1349_v62 = vld [vmem:[%s2472_s11 + $0x10] sm:$0xff]  ;;  %v1352_v63 = vld [vmem:[%s2472_s11 + $0x28] sm:$0xff]  ;;  %v1351_v0 = vld [vmem:[%s2472_s11 + $0x20] sm:$0xff] }
  0x1a   : > { %1826 = vmatmul.mubr.msk.bf16.vlgmr.msra.gmra.mrb[0].mxu0 %vm502_vm2, %v1918_v16  ;;  %v1354_v1 = vld [vmem:[%s2472_s11 + $0x38] sm:$0xff]  ;;  %v1353_v2 = vld [vmem:[%s2472_s11 + $0x30] sm:$0xff]  ;;  %v1356_v3 = vld [vmem:[%s2472_s11 + $0x48] sm:$0xff] }
  0x1b   : > { %1829 = vmatprep.mubr.msk.bf16.mxu0 %vm502_vm2, %v1919_v17  ;;  %v1355_v4 = vld [vmem:[%s2472_s11 + $0x40] sm:$0xff]  ;;  %v1358_v5 = vld [vmem:[%s2472_s11 + $0x58] sm:$0xff]  ;;  %v1357_v6 = vld [vmem:[%s2472_s11 + $0x50] sm:$0xff] }
  0x1c   : > { %678 = vperm.xlu1 %1916, %v648_v20   ;;  %673 = vperm.xlu0 %1915, %v647_v21   ;;  %v1360_v7 = vld [vmem:[%s2472_s11 + $0x68] sm:$0xff]  ;;  %v1359_v8 = vld [vmem:[%s2472_s11 + $0x60] sm:$0xff]  ;;  %v1362_v9 = vld [vmem:[%s2472_s11 + $0x78] sm:$0xff] }
  0x1d   : > { %v1361_v10 = vld [vmem:[%s2472_s11 + $0x70] sm:$0xff]  ;;  %v1921_v11 = vld [vmem:[%s2465_s4] sm:$0xff]   ;;  %v1460_v12 = vld [vmem:[%s2473_s12 + $0x8] sm:$0xff] }
  0x1e   : > { %v1459_v13 = vld [vmem:[%s2473_s12] sm:$0xff]  ;;  %v1462_v14 = vld [vmem:[%s2473_s12 + $0x18] sm:$0xff]  ;;  %v1461_v15 = vld [vmem:[%s2473_s12 + $0x10] sm:$0xff] }
  0x1f   : > { %v1464_v16 = vld [vmem:[%s2473_s12 + $0x28] sm:$0xff]  ;;  %v1463_v17 = vld [vmem:[%s2473_s12 + $0x20] sm:$0xff]  ;;  %v1466_v18 = vld [vmem:[%s2473_s12 + $0x38] sm:$0xff] }
  0x20   : > { %632 = vperm.xlu1 %1916, %v594_v23   ;;  %627 = vperm.xlu0 %1915, %v593_v24   ;;  %v1465_v19 = vld [vmem:[%s2473_s12 + $0x30] sm:$0xff]  ;;  %v1468_v20 = vld [vmem:[%s2473_s12 + $0x48] sm:$0xff]  ;;  %v1467_v21 = vld [vmem:[%s2473_s12 + $0x40] sm:$0xff] }
  0x21   : > { %v1469_v23 = vld [vmem:[%s2473_s12 + $0x50] sm:$0xff]  ;;  %v1472_v24 = vld [vmem:[%s2473_s12 + $0x68] sm:$0xff] }
  0x22   : > { %1830 = vmatmul.mubr.msk.bf16.gmra.mrb[4].mxu0 %vm502_vm2, %v1920_v22  ;;  %v1470_v22 = vld [vmem:[%s2473_s12 + $0x58] sm:$0xff] }
  0x23   : > { %1841 = vmatprep.mubr.msk.bf16.mxu0 %vm739_vm3, %v1921_v11 }
  0x24   : > { %688 = vperm.xlu1 %1916, %v650_v25   ;;  %683 = vperm.xlu0 %1915, %v649_v26   ;;  %v1471_v25 = vld [vmem:[%s2473_s12 + $0x60] sm:$0xff]  ;;  %v1474_v26 = vld [vmem:[%s2473_s12 + $0x78] sm:$0xff] }
  0x28   : > { %832 = vperm.xlu1 %1916, %v818_v27   ;;  %827 = vperm.xlu0 %1915, %v817_v28   ;;  %v1473_v27 = vld [vmem:[%s2473_s12 + $0x70] sm:$0xff] }
  0x2c   : > { %888 = vperm.xlu1 %1916, %v874_v29   ;;  %883 = vperm.xlu0 %1915, %v873_v30  }
  0x30   : > { %842 = vperm.xlu1 %1916, %v820_v31   ;;  %837 = vperm.xlu0 %1915, %v819_v32  }
  0x34   : > { %898 = vperm.xlu1 %1916, %v876_v33   ;;  %893 = vperm.xlu0 %1915, %v875_v34  }
  0x38   : > { %852 = vperm.xlu1 %1916, %v822_v35   ;;  %847 = vperm.xlu0 %1915, %v821_v36  }
  0x3c   : > { %908 = vperm.xlu1 %1916, %v878_v37   ;;  %903 = vperm.xlu0 %1915, %v877_v38  }
  0x40   : > { %862 = vperm.xlu1 %1916, %v824_v39   ;;  %857 = vperm.xlu0 %1915, %v823_v40  }
  0x44   : > { %918 = vperm.xlu1 %1916, %v880_v41   ;;  %913 = vperm.xlu0 %1915, %v879_v42  }
  0x48   : > { %1061 = vperm.xlu1 %1916, %v1047_v43   ;;  %1056 = vperm.xlu0 %1915, %v1046_v44  }
  0x4c   : > { %1117 = vperm.xlu1 %1916, %v1103_v45   ;;  %1112 = vperm.xlu0 %1915, %v1102_v46  }
  0x50   : > { %1071 = vperm.xlu1 %1916, %v1049_v47   ;;  %1066 = vperm.xlu0 %1915, %v1048_v48  }
  0x54   : > { %1127 = vperm.xlu1 %1916, %v1105_v49   ;;  %1122 = vperm.xlu0 %1915, %v1104_v50  }
  0x58   : > { %1081 = vperm.xlu1 %1916, %v1051_v51   ;;  %1076 = vperm.xlu0 %1915, %v1050_v52  }
  0x5c   : > { %1137 = vperm.xlu1 %1916, %v1107_v53   ;;  %1132 = vperm.xlu0 %1915, %v1106_v54  }
  0x60   : > { %1091 = vperm.xlu1 %1916, %v1053_v55   ;;  %1086 = vperm.xlu0 %1915, %v1052_v56  }
  0x64   : > { %1147 = vperm.xlu1 %1916, %v1109_v57   ;;  %1142 = vperm.xlu0 %1915, %v1108_v58  }
  0x68   : > { %1370 = vperm.xlu1 %1916, %v1348_v59   ;;  %1365 = vperm.xlu0 %1915, %v1347_v60  }
  0x6c   : > { %1380 = vperm.xlu1 %1916, %v1350_v61   ;;  %1375 = vperm.xlu0 %1915, %v1349_v62  }
  0x70   : > { %1390 = vperm.xlu1 %1916, %v1352_v63   ;;  %1385 = vperm.xlu0 %1915, %v1351_v0  }
  0x74   : > { %1400 = vperm.xlu1 %1916, %v1354_v1   ;;  %1395 = vperm.xlu0 %1915, %v1353_v2  }
  0x78   : > { %1410 = vperm.xlu1 %1916, %v1356_v3   ;;  %1405 = vperm.xlu0 %1915, %v1355_v4  }
  0x7c   : > { %1420 = vperm.xlu1 %1916, %v1358_v5   ;;  %1415 = vperm.xlu0 %1915, %v1357_v6  }
  0x80   : > { %1430 = vperm.xlu1 %1916, %v1360_v7   ;;  %1425 = vperm.xlu0 %1915, %v1359_v8  }
  0x84   : > { %1440 = vperm.xlu1 %1916, %v1362_v9   ;;  %1435 = vperm.xlu0 %1915, %v1361_v10  }
  0x87   : > { %v598_v28 = vpop.permute.xlu0 %597  ;;  %v654_v29 = vpop.permute.xlu1 %653 }
  0x88   : > { %1482 = vperm.xlu1 %1916, %v1460_v12   ;;  %1477 = vperm.xlu0 %1915, %v1459_v13  }
  0x8b   : > { %v603_v30 = vpop.permute.xlu0 %602  ;;  %v659_v31 = vpop.permute.xlu1 %658 }
  0x8c   : > { %1492 = vperm.xlu1 %1916, %v1462_v14   ;;  %1487 = vperm.xlu0 %1915, %v1461_v15  }
  0x8f   : > { %v608_v32 = vpop.permute.xlu0 %607  ;;  %v613_v33 = vpop.permute.xlu1 %612 }
  0x90   : > { %1502 = vperm.xlu1 %1916, %v1464_v16   ;;  %1497 = vperm.xlu0 %1915, %v1463_v17   ;;  %v1922_v16 = vld [vmem:[%s2465_s4 + $0x8] sm:$0xff]   ;;  %v1923_v17 = vld [vmem:[%s2465_s4 + $0x10] sm:$0xff]  }
  0x93   : > { %v664_v34 = vpop.permute.xlu0 %663  ;;  %v669_v35 = vpop.permute.xlu1 %668 }
  0x94   : > { %1512 = vperm.xlu1 %1916, %v1466_v18   ;;  %1507 = vperm.xlu0 %1915, %v1465_v19   ;;  %v1924_v18 = vld [vmem:[%s2465_s4 + $0x18] sm:$0xff]   ;;  %v1925_v19 = vld [vmem:[%s2468_s7] sm:$0xff]  }
  0x97   : > { %v618_v36 = vpop.permute.xlu0 %617  ;;  %v623_v37 = vpop.permute.xlu1 %622 }
  0x98   : > { %1522 = vperm.xlu1 %1916, %v1468_v20   ;;  %1517 = vperm.xlu0 %1915, %v1467_v21  }
  0x9b   : > { %v674_v38 = vpop.permute.xlu0 %673  ;;  %v679_v39 = vpop.permute.xlu1 %678 }
  0x9c   : > { %1532 = vperm.xlu1 %1916, %v1470_v22   ;;  %1527 = vperm.xlu0 %1915, %v1469_v23  }
  0x9f   : > { %v628_v47 = vpop.permute.xlu0 %627  ;;  %v633_v52 = vpop.permute.xlu1 %632 }
  0xa0   : > { %1542 = vperm.xlu1 %1916, %v1472_v24   ;;  %1537 = vperm.xlu0 %1915, %v1471_v25  }
  0xa3   : > { %v684_v62 = vpop.permute.xlu0 %683  ;;  %v689_v4 = vpop.permute.xlu1 %688 }
  0xa4   : > { %1552 = vperm.xlu1 %1916, %v1474_v26   ;;  %1547 = vperm.xlu0 %1915, %v1473_v27  }
  0xa7   : > { %v828_v20 = vpop.permute.xlu0 %827  ;;  %v833_v21 = vpop.permute.xlu1 %832 }
  0xab   : > { %v884_v22 = vpop.permute.xlu0 %883  ;;  %v889_v23 = vpop.permute.xlu1 %888 }
  0xaf   : > { %v838_v24 = vpop.permute.xlu0 %837  ;;  %v843_v25 = vpop.permute.xlu1 %842 }
  0xb3   : > { %v894_v26 = vpop.permute.xlu0 %893  ;;  %v899_v27 = vpop.permute.xlu1 %898 }
  0xed   : > { %v1827_v40 = vpop.f32.mrb[0].mxu0 }
  0xee   : > { %v637_v41 = vmul.f32 %v1827_v40, %v608_v32  ;;  %v556_v42 = vpop.f32.mrb[1].mxu0 }
  0xef   : > { %v635_v43 = vmul.f32 %v598_v28, %v556_v42  ;;  %v1828_v44 = vpop.f32.mrb[2].mxu0  ;;  %v848_v28 = vpop.permute.xlu0 %847 }
  0xf0   : > { %v693_v45 = vadd.f32 %v664_v34, %v637_v41  ;;  %v638_v46 = vmul.f32 %v1828_v44, %v613_v33  ;;  %v559_v48 = vpop.f32.mrb[3].mxu0 }
  0xf1   : > { %v691_v49 = vadd.f32 %v654_v29, %v635_v43  ;;  %v636_v51 = vmul.f32 %v603_v30, %v559_v48  ;;  %v853_v29 = vpop.permute.xlu1 %852 }
  0xf2   : > { %v694_v50 = vadd.f32 %v669_v35, %v638_v46  ;;  %v701_v53 = vmax.f32 %v693_v45, 0.0 }
  0xf3   : > { %v692_v55 = vadd.f32 %v659_v31, %v636_v51  ;;  %v699_v57 = vmax.f32 %v691_v49, 0.0  ;;  %v904_v30 = vpop.permute.xlu0 %903 }
  0xf4   : > { %v702_v54 = vmax.f32 %v694_v50, 0.0 }
  0xf5   : > { %v1831_v56 = vpop.f32.mrb[4].mxu0  ;;  %v700_v58 = vmax.f32 %v692_v55, 0.0  ;;  %v909_v31 = vpop.permute.xlu1 %908 }
  0xf6   : > { %v641_v59 = vmul.f32 %v1831_v56, %v628_v47  ;;  %v572_v60 = vpop.f32.mrb[5].mxu0  ;;  %v708_v61 = vpack.c.bf16 %v702_v54, %v701_v53 }
  0xf7   : > { %v639_v63 = vmul.f32 %v618_v36, %v572_v60  ;;  %v1832_v0 = vpop.f32.mrb[6].mxu0  ;;  %v707_v3 = vpack.c.bf16 %v700_v58, %v699_v57  ;;  %v858_v40 = vpop.permute.xlu0 %857 }
  0xf8   : > { %v697_v1 = vadd.f32 %v684_v62, %v641_v59  ;;  %v642_v2 = vmul.f32 %v1832_v0, %v633_v52  ;;  %v575_v5 = vpop.f32.mrb[7].mxu0 }
  0xf9   : > { %v695_v6 = vadd.f32 %v674_v38, %v639_v63  ;;  %v640_v8 = vmul.f32 %v623_v37, %v575_v5  ;;  %1833 = vmatprep.subr.bf16.mxu0 %v707_v3  ;;  %v863_v44 = vpop.permute.xlu1 %862 }
  0xfa   : > { %v698_v7 = vadd.f32 %v689_v4, %v642_v2  ;;  %1834 = vmatpush3.bf16.msra.mxu0 %v707_v3  ;;  %v705_v9 = vmax.f32 %v697_v1, 0.0 }
  0xfb   : > { %v696_v11 = vadd.f32 %v679_v39, %v640_v8  ;;  %1835 = vmatprep.subr.bf16.mxu0 %v708_v61  ;;  %v703_v12 = vmax.f32 %v695_v6, 0.0  ;;  %v914_v54 = vpop.permute.xlu0 %913  ;;  %v1926_v8 = vld [vmem:[%s2468_s7 + $0x8] sm:$0xff]  }
  0xfc   : > { %v706_v10 = vmax.f32 %v698_v7, 0.0 }
  0xfd   : > { %v704_v13 = vmax.f32 %v696_v11, 0.0  ;;  %v1929_v11 = vld [vmem:[%s2471_s10] sm:$0xff]  }
  0xfe   : > { %v710_v14 = vpack.c.bf16 %v706_v10, %v705_v9  ;;  %1836 = vmatpush3.bf16.msra.mxu0 %v708_v61  ;;  %v919_v61 = vpop.permute.xlu1 %918  ;;  %v1927_v9 = vld [vmem:[%s2468_s7 + $0x10] sm:$0xff]   ;;  %v1928_v10 = vld [vmem:[%s2468_s7 + $0x18] sm:$0xff]   ;;  %1873 = vmatprep.mubr.msk.bf16.mxu1 %vm739_vm3, %v1929_v11 }
  0xff   : > { %v709_v15 = vpack.c.bf16 %v704_v13, %v703_v12  ;;  %v1057_v12 = vpop.permute.xlu0 %1056 }
 0x101   : > { %1837 = vmatprep.subr.bf16.mxu0 %v709_v15 }
 0x102   : > { %1838 = vmatpush3.bf16.msra.mxu0 %v709_v15  ;;  %v1062_v13 = vpop.permute.xlu1 %1061 }
 0x103   : > { %1839 = vmatprep.subr.bf16.mxu0 %v710_v14 }
 0x106   : > { %1840 = vmatpush3.bf16.msra.mxu0 %v710_v14  ;;  %v1113_v14 = vpop.permute.xlu0 %1112  ;;  %v1118_v15 = vpop.permute.xlu1 %1117 }
 0x109   : > { %1842 = vmatmul.mubr.msk.bf16.vlgmr.msra.gmra.mrb[8].mxu0 %vm739_vm3, %v1922_v16 }
 0x10a   : > { %1845 = vmatprep.mubr.msk.bf16.mxu0 %vm739_vm3, %v1923_v17  ;;  %v1067_v16 = vpop.permute.xlu0 %1066  ;;  %v1072_v17 = vpop.permute.xlu1 %1071 }
 0x111   : > { %1846 = vmatmul.mubr.msk.bf16.gmra.mrb[12].mxu0 %vm739_vm3, %v1924_v18  ;;  %v1123_v18 = vpop.permute.xlu0 %1122 }
 0x112   : > { %1857 = vmatprep.mubr.msk.bf16.mxu0 %vm739_vm3, %v1925_v19  ;;  %v1128_v19 = vpop.permute.xlu1 %1127 }
 0x1dc   : > { %v1843_v32 = vpop.f32.mrb[8].mxu0 }
 0x1dd   : > { %v867_v33 = vmul.f32 %v1843_v32, %v838_v24  ;;  %v786_v34 = vpop.f32.mrb[9].mxu0 }
 0x1de   : > { %v865_v35 = vmul.f32 %v828_v20, %v786_v34  ;;  %v1844_v36 = vpop.f32.mrb[10].mxu0  ;;  %v1077_v20 = vpop.permute.xlu0 %1076 }
 0x1df   : > { %v923_v37 = vadd.f32 %v894_v26, %v867_v33  ;;  %v868_v38 = vmul.f32 %v1844_v36, %v843_v25  ;;  %v789_v39 = vpop.f32.mrb[11].mxu0 }
 0x1e0   : > { %v921_v41 = vadd.f32 %v884_v22, %v865_v35  ;;  %v866_v42 = vmul.f32 %v833_v21, %v789_v39  ;;  %v1082_v21 = vpop.permute.xlu1 %1081 }
 0x1e1   : > { %v924_v43 = vadd.f32 %v899_v27, %v868_v38  ;;  %v931_v46 = vmax.f32 %v923_v37, 0.0 }
 0x1e2   : > { %v922_v45 = vadd.f32 %v889_v23, %v866_v42  ;;  %v929_v48 = vmax.f32 %v921_v41, 0.0  ;;  %v1133_v22 = vpop.permute.xlu0 %1132 }
 0x1e3   : > { %v932_v47 = vmax.f32 %v924_v43, 0.0 }
 0x1e4   : > { %v930_v49 = vmax.f32 %v922_v45, 0.0  ;;  %v1847_v50 = vpop.f32.mrb[12].mxu0  ;;  %v1138_v23 = vpop.permute.xlu1 %1137 }
 0x1e5   : > { %v871_v51 = vmul.f32 %v1847_v50, %v858_v40  ;;  %v802_v52 = vpop.f32.mrb[13].mxu0  ;;  %v938_v53 = vpack.c.bf16 %v932_v47, %v931_v46 }
 0x1e6   : > { %v869_v55 = vmul.f32 %v848_v28, %v802_v52  ;;  %v1848_v56 = vpop.f32.mrb[14].mxu0  ;;  %v937_v57 = vpack.c.bf16 %v930_v49, %v929_v48  ;;  %v1087_v32 = vpop.permute.xlu0 %1086 }
 0x1e7   : > { %v927_v58 = vadd.f32 %v914_v54, %v871_v51  ;;  %v872_v59 = vmul.f32 %v1848_v56, %v863_v44  ;;  %v805_v60 = vpop.f32.mrb[15].mxu0 }
 0x1e8   : > { %v925_v62 = vadd.f32 %v904_v30, %v869_v55  ;;  %v870_v63 = vmul.f32 %v853_v29, %v805_v60  ;;  %1849 = vmatprep.subr.bf16.mxu0 %v937_v57  ;;  %v1092_v36 = vpop.permute.xlu1 %1091 }
 0x1e9   : > { %v928_v0 = vadd.f32 %v919_v61, %v872_v59  ;;  %1850 = vmatpush3.bf16.msra.mxu0 %v937_v57  ;;  %v935_v2 = vmax.f32 %v927_v58, 0.0 }
 0x1ea   : > { %v926_v1 = vadd.f32 %v909_v31, %v870_v63  ;;  %1851 = vmatprep.subr.bf16.mxu0 %v938_v53  ;;  %v933_v4 = vmax.f32 %v925_v62, 0.0  ;;  %v1143_v46 = vpop.permute.xlu0 %1142 }
 0x1eb   : > { %v936_v3 = vmax.f32 %v928_v0, 0.0  ;;  %v1930_v0 = vld [vmem:[%s2471_s10 + $0x8] sm:$0xff]  }
 0x1ec   : > { %v934_v5 = vmax.f32 %v926_v1, 0.0  ;;  %v1931_v1 = vld [vmem:[%s2471_s10 + $0x10] sm:$0xff]  }
 0x1ed   : > { %1852 = vmatpush3.bf16.msra.mxu0 %v938_v53  ;;  %v940_v6 = vpack.c.bf16 %v936_v3, %v935_v2  ;;  %v1148_v53 = vpop.permute.xlu1 %1147  ;;  %v1932_v2 = vld [vmem:[%s2471_s10 + $0x18] sm:$0xff]   ;;  %v1933_v3 = vld [vmem:[%s2471_s10 + $0x20] sm:$0xff]  }
 0x1ee   : > { %v939_v7 = vpack.c.bf16 %v934_v5, %v933_v4  ;;  %v1934_v4 = vld [vmem:[%s2471_s10 + $0x28] sm:$0xff]   ;;  %v1935_v5 = vld [vmem:[%s2471_s10 + $0x30] sm:$0xff]  }
 0x1f0   : > { %1853 = vmatprep.subr.bf16.mxu0 %v939_v7 }
 0x1f1   : > { %1854 = vmatpush3.bf16.msra.mxu0 %v939_v7  ;;  %v1366_v7 = vpop.permute.xlu0 %1365 }
 0x1f2   : > { %1855 = vmatprep.subr.bf16.mxu0 %v940_v6 }
 0x1f5   : > { %1856 = vmatpush3.bf16.msra.mxu0 %v940_v6  ;;  %v1936_v6 = vld [vmem:[%s2471_s10 + $0x38] sm:$0xff]  }
 0x1f8   : > { %1858 = vmatmul.mubr.msk.bf16.vlgmr.msra.gmra.mrb[16].mxu0 %vm739_vm3, %v1926_v8  ;;  %v1371_v8 = vpop.permute.xlu1 %1370 }
 0x1f9   : > { %1861 = vmatprep.mubr.msk.bf16.mxu0 %vm739_vm3, %v1927_v9  ;;  %v1376_v9 = vpop.permute.xlu0 %1375 }
 0x1fd   : > { %v1386_v11 = vpop.permute.xlu0 %1385 }
 0x200   : > { %1862 = vmatmul.mubr.msk.bf16.gmra.mrb[20].mxu0 %vm739_vm3, %v1928_v10  ;;  %v1381_v10 = vpop.permute.xlu1 %1380 }
 0x2cb   : > { %v1859_v24 = vpop.f32.mrb[16].mxu0 }
 0x2cc   : > { %v1096_v25 = vmul.f32 %v1859_v24, %v1067_v16  ;;  %v1015_v26 = vpop.f32.mrb[17].mxu0 }
 0x2cd   : > { %v1094_v27 = vmul.f32 %v1057_v12, %v1015_v26  ;;  %v1860_v28 = vpop.f32.mrb[18].mxu0  ;;  %v1391_v12 = vpop.permute.xlu1 %1390 }
 0x2ce   : > { %v1152_v29 = vadd.f32 %v1123_v18, %v1096_v25  ;;  %v1097_v30 = vmul.f32 %v1860_v28, %v1072_v17  ;;  %v1018_v31 = vpop.f32.mrb[19].mxu0 }
 0x2cf   : > { %v1150_v33 = vadd.f32 %v1113_v14, %v1094_v27  ;;  %v1095_v34 = vmul.f32 %v1062_v13, %v1018_v31  ;;  %v1396_v13 = vpop.permute.xlu0 %1395 }
 0x2d0   : > { %v1153_v35 = vadd.f32 %v1128_v19, %v1097_v30  ;;  %v1160_v38 = vmax.f32 %v1152_v29, 0.0 }
 0x2d1   : > { %v1151_v37 = vadd.f32 %v1118_v15, %v1095_v34  ;;  %v1158_v40 = vmax.f32 %v1150_v33, 0.0  ;;  %v1401_v14 = vpop.permute.xlu1 %1400 }
 0x2d2   : > { %v1161_v39 = vmax.f32 %v1153_v35, 0.0 }
 0x2d3   : > { %v1159_v41 = vmax.f32 %v1151_v37, 0.0  ;;  %v1863_v42 = vpop.f32.mrb[20].mxu0  ;;  %v2377_v15 = vpop.permute.xlu0 %1405 }
 0x2d4   : > { %v1100_v43 = vmul.f32 %v1863_v42, %v1087_v32  ;;  %v1031_v44 = vpop.f32.mrb[21].mxu0  ;;  %v1167_v45 = vpack.c.bf16 %v1161_v39, %v1160_v38 }
 0x2d5   : > { %v1098_v47 = vmul.f32 %v1077_v20, %v1031_v44  ;;  %v1864_v48 = vpop.f32.mrb[22].mxu0  ;;  %v1166_v49 = vpack.c.bf16 %v1159_v41, %v1158_v40  ;;  %v2379_v16 = vpop.permute.xlu1 %1410 }
 0x2d6   : > { %v1156_v50 = vadd.f32 %v1143_v46, %v1100_v43  ;;  %v1101_v51 = vmul.f32 %v1864_v48, %v1092_v36  ;;  %v1034_v52 = vpop.f32.mrb[23].mxu0 }
 0x2d7   : > { %v1154_v54 = vadd.f32 %v1133_v22, %v1098_v47  ;;  %v1099_v55 = vmul.f32 %v1082_v21, %v1034_v52  ;;  %1865 = vmatprep.subr.bf16.mxu1 %v1166_v49  ;;  %v1416_v17 = vpop.permute.xlu0 %1415 }
 0x2d8   : > { %v1157_v56 = vadd.f32 %v1148_v53, %v1101_v51  ;;  %1866 = vmatpush3.bf16.msra.mxu1 %v1166_v49  ;;  %v1164_v58 = vmax.f32 %v1156_v50, 0.0 }
 0x2d9   : > { %v1155_v57 = vadd.f32 %v1138_v23, %v1099_v55  ;;  %1867 = vmatprep.subr.bf16.mxu1 %v1167_v45  ;;  %v1162_v60 = vmax.f32 %v1154_v54, 0.0  ;;  %v2381_v18 = vpop.permute.xlu1 %1420 }
 0x2da   : > { %v1165_v59 = vmax.f32 %v1157_v56, 0.0 }
 0x2db   : > { %v1163_v61 = vmax.f32 %v1155_v57, 0.0  ;;  %v2383_v19 = vpop.permute.xlu0 %1425 }
 0x2dc   : > { %1868 = vmatpush3.bf16.msra.mxu1 %v1167_v45  ;;  %v1169_v62 = vpack.c.bf16 %v1165_v59, %v1164_v58 }
 0x2dd   : > { %v1168_v63 = vpack.c.bf16 %v1163_v61, %v1162_v60  ;;  %v2385_v20 = vpop.permute.xlu1 %1430 }
 0x2df   : > { %1869 = vmatprep.subr.bf16.mxu1 %v1168_v63  ;;  %v2387_v21 = vpop.permute.xlu0 %1435 }
 0x2e0   : > { %1870 = vmatpush3.bf16.msra.mxu1 %v1168_v63 }
 0x2e1   : > { %1871 = vmatprep.subr.bf16.mxu1 %v1169_v62  ;;  %v2389_v22 = vpop.permute.xlu1 %1440 }
 0x2e3   : > { %v1478_v23 = vpop.permute.xlu0 %1477 }
 0x2e4   : > { %1872 = vmatpush3.bf16.msra.mxu1 %v1169_v62 }
 0x2e5   : > { %v1483_v24 = vpop.permute.xlu1 %1482 }
 0x2e7   : > { %1874 = vmatmul.mubr.msk.bf16.vlgmr.msra.gmra.mrb[0].mxu1 %vm739_vm3, %v1930_v0  ;;  %v1488_v25 = vpop.permute.xlu0 %1487 }
 0x2e8   : > { %1877 = vmatprep.mubr.msk.bf16.mxu1 %vm739_vm3, %v1931_v1 }
 0x2e9   : > { %v1493_v26 = vpop.permute.xlu1 %1492 }
 0x2eb   : > { %v1498_v27 = vpop.permute.xlu0 %1497 }
 0x2ed   : > { %v1503_v28 = vpop.permute.xlu1 %1502 }
 0x2ef   : > { %1878 = vmatmul.mubr.msk.bf16.gmra.mrb[4].mxu1 %vm739_vm3, %v1932_v2  ;;  %v1508_v34 = vpop.permute.xlu0 %1507 }
 0x2f0   : > { %1881 = vmatprep.mubr.msk.bf16.mxu1 %vm739_vm3, %v1933_v3 }
 0x2f1   : > { %v1513_v41 = vpop.permute.xlu1 %1512 }
 0x2f3   : > { %v1518_v48 = vpop.permute.xlu0 %1517 }
 0x2f5   : > { %v1523_v59 = vpop.permute.xlu1 %1522 }
 0x2f7   : > { %1882 = vmatmul.mubr.msk.bf16.gmra.mrb[8].mxu1 %vm739_vm3, %v1934_v4  ;;  %v1528_v1 = vpop.permute.xlu0 %1527 }
 0x2f8   : > { %1885 = vmatprep.mubr.msk.bf16.mxu1 %vm739_vm3, %v1935_v5 }
 0x2ff   : > { %1886 = vmatmul.mubr.msk.bf16.gmra.mrb[12].mxu1 %vm739_vm3, %v1936_v6 }
 0x3ba   : > { %v1875_v29 = vpop.f32.mrb[0].mxu1 }
 0x3bb   : > { %v1445_v30 = vmul.f32 %v1875_v29, %v1376_v9  ;;  %v1284_v31 = vpop.f32.mrb[1].mxu1  ;;  %v1533_v9 = vpop.permute.xlu1 %1532 }
 0x3bc   : > { %v1443_v32 = vmul.f32 %v1366_v7, %v1284_v31  ;;  %v1876_v33 = vpop.f32.mrb[2].mxu1 }
 0x3bd   : > { %v1557_v35 = vadd.f32 %v1488_v25, %v1445_v30  ;;  %v1446_v36 = vmul.f32 %v1876_v33, %v1381_v10  ;;  %v1287_v37 = vpop.f32.mrb[3].mxu1 }
 0x3be   : > { %v1555_v38 = vadd.f32 %v1478_v23, %v1443_v32  ;;  %v1444_v39 = vmul.f32 %v1371_v8, %v1287_v37 }
 0x3bf   : > { %v1573_v40 = vmax.f32 %v1557_v35, 0.0  ;;  %v1558_v43 = vadd.f32 %v1493_v26, %v1446_v36  ;;  %v1543_v33 = vpop.permute.xlu1 %1542 }
 0x3c0   : > { %v1556_v42 = vadd.f32 %v1483_v24, %v1444_v39  ;;  %v1571_v45 = vmax.f32 %v1555_v38, 0.0 }
 0x3c1   : > { %v1594_v44 = vsel %vm1587_vm4, %v1573_v40, -inf  ;;  %v1574_v58 = vmax.f32 %v1558_v43, 0.0 }
 0x3c2   : > { %1595 = vmax.xlane.f32.xlu0 %v1594_v44  ;;  %v1879_v46 = vpop.f32.mrb[4].mxu1  ;;  %v1572_v47 = vmax.f32 %v1556_v42, 0.0  ;;  %v1588_v57 = vsel %vm1587_vm4, %v1571_v45, -inf }
 0x3c3   : > { %v1449_v49 = vmul.f32 %v1879_v46, %v1396_v13  ;;  %v1300_v50 = vpop.f32.mrb[5].mxu1  ;;  %v1597_v2 = vsel %vm1587_vm4, %v1574_v58, -inf }
 0x3c4   : > { %v1447_v51 = vmul.f32 %v1386_v11, %v1300_v50  ;;  %v1880_v52 = vpop.f32.mrb[6].mxu1  ;;  %v1591_v53 = vsel %vm1587_vm4, %v1572_v47, -inf }
 0x3c5   : > { %v1561_v54 = vadd.f32 %v1508_v34, %v1449_v49  ;;  %v1450_v55 = vmul.f32 %v1880_v52, %v1401_v14  ;;  %1592 = vmax.xlane.f32.xlu1 %v1591_v53  ;;  %v1303_v56 = vpop.f32.mrb[7].mxu1 }
 0x3c6   : > { %v1559_v60 = vadd.f32 %v1498_v27, %v1447_v51  ;;  %v1448_v61 = vmul.f32 %v1391_v12, %v1303_v56  ;;  %1589 = vmax.xlane.f32.xlu0 %v1588_v57 }
 0x3c7   : > { %v1562_v62 = vadd.f32 %v1513_v41, %v1450_v55  ;;  %v1577_v63 = vmax.f32 %v1561_v54, 0.0 }
 0x3c8   : > { %v1560_v0 = vadd.f32 %v1503_v28, %v1448_v61  ;;  %v1575_v4 = vmax.f32 %v1559_v60, 0.0 }
 0x3c9   : > { %v1606_v3 = vsel %vm1587_vm4, %v1577_v63, -inf  ;;  %v1578_v5 = vmax.f32 %v1562_v62, 0.0 }
 0x3ca   : > { %1598 = vmax.xlane.f32.xlu0 %v1597_v2  ;;  %1607 = vmax.xlane.f32.xlu1 %v1606_v3  ;;  %v1883_v6 = vpop.f32.mrb[8].mxu1  ;;  %v1576_v12 = vmax.f32 %v1560_v0, 0.0  ;;  %v1600_v24 = vsel %vm1587_vm4, %v1575_v4, -inf }
 0x3cb   : > { %v1453_v7 = vmul.f32 %v1883_v6, %v1416_v17  ;;  %v1316_v8 = vpop.f32.mrb[9].mxu1  ;;  %v1609_v25 = vsel %vm1587_vm4, %v1578_v5, -inf  ;;  %v1538_v17 = vpop.permute.xlu0 %1537 }
 0x3cc   : > { %v1451_v10 = vmul.f32 %v2377_v15, %v1316_v8  ;;  %v1884_v11 = vpop.f32.mrb[10].mxu1  ;;  %v1603_v15 = vsel %vm1587_vm4, %v1576_v12, -inf }
 0x3cd   : > { %v1565_v13 = vadd.f32 %v1528_v1, %v1453_v7  ;;  %v1454_v14 = vmul.f32 %v1884_v11, %v2381_v18  ;;  %v1319_v23 = vpop.f32.mrb[11].mxu1 }
 0x3ce   : > { %v1563_v26 = vadd.f32 %v1518_v48, %v1451_v10  ;;  %v1452_v27 = vmul.f32 %v2379_v16, %v1319_v23  ;;  %1601 = vmax.xlane.f32.xlu1 %v1600_v24  ;;  %1610 = vmax.xlane.f32.xlu0 %v1609_v25 }
 0x3cf   : > { %v1566_v28 = vadd.f32 %v1533_v9, %v1454_v14  ;;  %v1581_v29 = vmax.f32 %v1565_v13, 0.0  ;;  %v1548_v38 = vpop.permute.xlu0 %1547 }
 0x3d0   : > { %v1564_v30 = vadd.f32 %v1523_v59, %v1452_v27  ;;  %v1579_v32 = vmax.f32 %v1563_v26, 0.0 }
 0x3d1   : > { %v1618_v31 = vsel %vm1587_vm4, %v1581_v29, -inf  ;;  %v1582_v18 = vmax.f32 %v1566_v28, 0.0 }
 0x3d2   : > { %1604 = vmax.xlane.f32.xlu0 %v1603_v15  ;;  %1619 = vmax.xlane.f32.xlu1 %v1618_v31  ;;  %v1887_v34 = vpop.f32.mrb[12].mxu1  ;;  %v1612_v41 = vsel %vm1587_vm4, %v1579_v32, -inf  ;;  %v1580_v43 = vmax.f32 %v1564_v30, 0.0 }
 0x3d3   : > { %v1457_v35 = vmul.f32 %v1887_v34, %v2387_v21  ;;  %v1332_v36 = vpop.f32.mrb[13].mxu1  ;;  %v1621_v42 = vsel %vm1587_vm4, %v1582_v18, -inf  ;;  %v1553_v21 = vpop.permute.xlu1 %1552 }
 0x3d4   : > { %v1455_v16 = vmul.f32 %v2383_v19, %v1332_v36  ;;  %v1888_v37 = vpop.f32.mrb[14].mxu1  ;;  %v1615_v49 = vsel %vm1587_vm4, %v1580_v43, -inf }
 0x3d5   : > { %v1458_v39 = vmul.f32 %v1888_v37, %v2389_v22  ;;  %v1335_v40 = vpop.f32.mrb[15].mxu1  ;;  %v1569_v44 = vadd.f32 %v1548_v38, %v1457_v35 }
 0x3d6   : > { %v1567_v45 = vadd.f32 %v1538_v17, %v1455_v16  ;;  %v1456_v46 = vmul.f32 %v2385_v20, %v1335_v40  ;;  %1613 = vmax.xlane.f32.xlu1 %v1612_v41  ;;  %1622 = vmax.xlane.f32.xlu0 %v1621_v42 }
 0x3d7   : > { %v1570_v48 = vadd.f32 %v1553_v21, %v1458_v39  ;;  %v1585_v51 = vmax.f32 %v1569_v44, 0.0 }
 0x3d8   : > { %v1568_v47 = vadd.f32 %v1543_v33, %v1456_v46  ;;  %v1583_v19 = vmax.f32 %v1567_v45, 0.0 }
 0x3d9   : > { %v1586_v53 = vmax.f32 %v1570_v48, 0.0  ;;  %v1630_v20 = vsel %vm1587_vm4, %v1585_v51, -inf }
 0x3da   : > { %1616 = vmax.xlane.f32.xlu0 %v1615_v49  ;;  %v1624_v22 = vsel %vm1587_vm4, %v1583_v19, -inf  ;;  %v1584_v50 = vmax.f32 %v1568_v47, 0.0 }
 0x3db   : > { %1625 = vmax.xlane.f32.xlu1 %v1624_v22  ;;  %v1633_v54 = vsel %vm1587_vm4, %v1586_v53, -inf }
 0x3dc   : > { %v1627_v52 = vsel %vm1587_vm4, %v1584_v50, -inf }
 0x3de   : > { %1628 = vmax.xlane.f32.xlu0 %v1627_v52 }
 0x3df   : > { %1631 = vmax.xlane.f32.xlu1 %v1630_v20 }
 0x3e2   : > { %1634 = vmax.xlane.f32.xlu0 %v1633_v54 }
 0x44f   : > { %v1596_v55 = vpop.xlane.xlu0 %1595 }
 0x450   : > { %1639 = vst.msk [vmem:[%s2418_s24 + $0x10] sm:$0xff] %vm1636_vm5, %v1596_v55 }
 0x452   : > { %v1593_v56 = vpop.xlane.xlu1 %1592 }
 0x453   : > { %1638 = vst.msk [vmem:[%s2418_s24 + $0x8] sm:$0xff] %vm1636_vm5, %v1593_v56  ;;  %v1590_v57 = vpop.xlane.xlu0 %1589 }
 0x454   : > { %1637 = vst.msk [vmem:[%s2418_s24] sm:$0xff] %vm1636_vm5, %v1590_v57 }
 0x457   : > { %v1599_v58 = vpop.xlane.xlu0 %1598  ;;  %v1608_v59 = vpop.xlane.xlu1 %1607 }
 0x458   : > { %1640 = vst.msk [vmem:[%s2418_s24 + $0x18] sm:$0xff] %vm1636_vm5, %v1599_v58  ;;  %1643 = vst.msk [vmem:[%s2418_s24 + $0x30] sm:$0xff] %vm1636_vm5, %v1608_v59 }
 0x45b   : > { %v1602_v60 = vpop.xlane.xlu1 %1601  ;;  %v1611_v61 = vpop.xlane.xlu0 %1610 }
 0x45c   : > { %1641 = vst.msk [vmem:[%s2418_s24 + $0x20] sm:$0xff] %vm1636_vm5, %v1602_v60  ;;  %1644 = vst.msk [vmem:[%s2418_s24 + $0x38] sm:$0xff] %vm1636_vm5, %v1611_v61 }
 0x45f   : > { %v1605_v62 = vpop.xlane.xlu0 %1604  ;;  %v1620_v63 = vpop.xlane.xlu1 %1619 }
 0x460   : > { %1642 = vst.msk [vmem:[%s2418_s24 + $0x28] sm:$0xff] %vm1636_vm5, %v1605_v62  ;;  %1647 = vst.msk [vmem:[%s2418_s24 + $0x50] sm:$0xff] %vm1636_vm5, %v1620_v63 }
 0x463   : > { %v1614_v0 = vpop.xlane.xlu1 %1613  ;;  %v1623_v1 = vpop.xlane.xlu0 %1622 }
 0x464   : > { %1645 = vst.msk [vmem:[%s2418_s24 + $0x40] sm:$0xff] %vm1636_vm5, %v1614_v0  ;;  %1648 = vst.msk [vmem:[%s2418_s24 + $0x58] sm:$0xff] %vm1636_vm5, %v1623_v1 }
 0x467   : > { %v1617_v2 = vpop.xlane.xlu0 %1616 }
 0x468   : > { %1646 = vst.msk [vmem:[%s2418_s24 + $0x48] sm:$0xff] %vm1636_vm5, %v1617_v2  ;;  %v1626_v3 = vpop.xlane.xlu1 %1625 }
 0x469   : > { %1649 = vst.msk [vmem:[%s2418_s24 + $0x60] sm:$0xff] %vm1636_vm5, %v1626_v3 }
 0x46b   : > { %v1629_v4 = vpop.xlane.xlu0 %1628 }
 0x46c   : > { %1650 = vst.msk [vmem:[%s2418_s24 + $0x68] sm:$0xff] %vm1636_vm5, %v1629_v4  ;;  %v1632_v5 = vpop.xlane.xlu1 %1631 }
 0x46d   : > { %1651 = vst.msk [vmem:[%s2418_s24 + $0x70] sm:$0xff] %vm1636_vm5, %v1632_v5 }
 0x46f   : > { %v1635_v6 = vpop.xlane.xlu0 %1634 }
 0x470   : > { %1652 = vst.msk [vmem:[%s2418_s24 + $0x78] sm:$0xff] %vm1636_vm5, %v1635_v6 }
 0x471 PF: > { %s23_s27 = sadd.s32 1, %s1959_s27   ;;  %s2475_s25 = smov %s1955_s26 }
 0x472   : > { %p20_p5 = scmp.ge.s32.totalorder %s23_s27, 4   ;;  %s2476_s26 = smov %s2478_s28 }
 0x474   :  { %22 = sbr.rel (!%p20_p5) target bundleno = 2 (0x2), region = 102 }

</bundles_post_ra>
